<compile_context>
chip_gen: v7x
topology: tpu7x:2x2x1
jax: 0.10.0
libtpu: 0.0.40
codegen_flags: <defaults>
</compile_context>

<pallas_src>
import jax
import jax.numpy as jnp
from jax.experimental import pallas as pl
from jax.experimental.pallas import tpu as pltpu


def _outedge_kernel(x1_ref, x2_ref, w1_ref, w2_ref, w3_ref, b_ref, o_ref):
    # b_ref: (Cout, 3), columns = [bias1, bias2, bias3].  BN scales are already
    # folded into w1/w2/w3.  Channels live on the sublane axis, so a (Cout, 1)
    # bias broadcasts across the lane-dense spatial tile naturally.
    b1 = b_ref[:, 0:1]
    b2 = b_ref[:, 1:2]
    b3 = b_ref[:, 2:3]

    # branch 1: conv1 (scale-folded) -> +bias -> ReLU   (f32 accumulation)
    f = jnp.dot(w1_ref[...], x1_ref[...], preferred_element_type=jnp.float32)
    f = jnp.maximum(f + b1, 0.0)

    # branch 2: conv2 (scale-folded) -> +bias -> ReLU
    g = jnp.dot(w2_ref[...], x2_ref[...], preferred_element_type=jnp.float32)
    g = jnp.maximum(g + b2, 0.0)

    # edge = foreg - backg, then conv3 -> +bias -> ReLU
    e = (f - g).astype(w3_ref.dtype)
    y = jnp.dot(w3_ref[...], e, preferred_element_type=jnp.float32)
    y = jnp.maximum(y + b3, 0.0)

    o_ref[...] = y.astype(o_ref.dtype)


def _spatial_tile(hw, tm):
    """Pick a lane tile: a 128-multiple <= tm, or the full spatial extent."""
    tile = max((tm // 128) * 128, 128)
    return hw if hw <= tile else tile


def outedge_pallas(x1, x2, w1, w2, w3, biases, *, out_dtype=jnp.float32, tm=1024):
    """x1: (N, C1, HW), x2: (N, C2, HW); w*: (Cout, Cin); biases: (Cout, 3)."""
    N, C1, HW = x1.shape
    _, C2, _ = x2.shape
    Cout = w1.shape[0]

    tile = _spatial_tile(HW, tm)
    grid = (N, pl.cdiv(HW, tile))  # partial trailing tile handled by Pallas masking

    return pl.pallas_call(
        _outedge_kernel,
        out_shape=jax.ShapeDtypeStruct((N, Cout, HW), out_dtype),
        grid_spec=pltpu.PrefetchScalarGridSpec(
            num_scalar_prefetch=0,
            grid=grid,
            in_specs=[
                pl.BlockSpec((None, C1, tile), lambda n, j: (n, 0, j)),
                pl.BlockSpec((None, C2, tile), lambda n, j: (n, 0, j)),
                # Weights / biases: constant block index -> stay VMEM-resident.
                pl.BlockSpec((Cout, C1), lambda n, j: (0, 0)),
                pl.BlockSpec((Cout, C2), lambda n, j: (0, 0)),
                pl.BlockSpec((Cout, Cout), lambda n, j: (0, 0)),
                pl.BlockSpec((Cout, 3), lambda n, j: (0, 0)),
            ],
            out_specs=pl.BlockSpec((None, Cout, tile), lambda n, j: (n, 0, j)),
        ),
        compiler_params=pltpu.CompilerParams(
            dimension_semantics=("parallel", "parallel"),
        ),
    )(x1, x2, w1, w2, w3, biases)


def fold_bn(gamma, beta, mean, var, eps=1e-5):
    scale = gamma / jnp.sqrt(var + eps)
    bias = beta - mean * scale
    return scale, bias


def outedge_forward(foreg, backg, weights, *, tm=1024, eps=1e-5, compute_dtype=None):
    """foreg: (N, C1, H, W), backg: (N, C2, H, W) in NCHW (PyTorch convention).

    eps must match the PyTorch BatchNorm2d eps (default 1e-5).
    compute_dtype (e.g. jnp.bfloat16) selects the matmul input dtype; the
    accumulation and output stay float32.
    """
    N, C1, H, W = foreg.shape
    _, C2, _, _ = backg.shape
    (w1, bn1), (w2, bn2), (w3, bn3) = weights
    Cout = w1.shape[0]
    HW = H * W

    if compute_dtype is None:
        compute_dtype = foreg.dtype
    out_dtype = foreg.dtype

    # NCHW -> (N, C, H*W): pure reshape, no transpose.
    x1 = foreg.reshape(N, C1, HW).astype(compute_dtype)
    x2 = backg.reshape(N, C2, HW).astype(compute_dtype)

    s1, b1 = fold_bn(*bn1, eps=eps)
    s2, b2 = fold_bn(*bn2, eps=eps)
    s3, b3 = fold_bn(*bn3, eps=eps)

    # 1x1 conv weights (Cout, Cin, 1, 1) -> (Cout, Cin), BN scale folded in.
    w1m = (w1.reshape(Cout, C1) * s1[:, None]).astype(compute_dtype)
    w2m = (w2.reshape(Cout, C2) * s2[:, None]).astype(compute_dtype)
    w3m = (w3.reshape(Cout, Cout) * s3[:, None]).astype(compute_dtype)

    biases = jnp.stack([b1, b2, b3], axis=1).astype(jnp.float32)  # (Cout, 3)

    out = outedge_pallas(x1, x2, w1m, w2m, w3m, biases, out_dtype=out_dtype, tm=tm)
    return out.reshape(N, Cout, H, W)


def outedge_reference(foreg, backg, weights, eps=1e-5):
    """Pure-JAX reference (eval-mode BN) for correctness check."""
    (w1, bn1), (w2, bn2), (w3, bn3) = weights

    def conv_bn_relu(x, w, bn):
        Cout, Cin = w.shape[0], w.shape[1]
        y = jnp.einsum("nchw,oc->nohw", x, w.reshape(Cout, Cin))
        s, b = fold_bn(*bn, eps=eps)
        y = y * s[None, :, None, None] + b[None, :, None, None]
        return jnp.maximum(y, 0.0)

    f = conv_bn_relu(foreg, w1, bn1)
    g = conv_bn_relu(backg, w2, bn2)
    return conv_bn_relu(f - g, w3, bn3)


def make_weights(key, in_c, out_c):
    k1, k2, k3, k4, k5 = jax.random.split(key, 5)
    w = jax.random.normal(k1, (out_c, in_c, 1, 1), jnp.float32) * 0.1
    gamma = jax.random.uniform(k2, (out_c,), jnp.float32, 0.5, 1.5)
    beta = jax.random.normal(k3, (out_c,), jnp.float32) * 0.1
    mean = jax.random.normal(k4, (out_c,), jnp.float32) * 0.1
    var = jax.random.uniform(k5, (out_c,), jnp.float32, 0.5, 1.5)
    return w, (gamma, beta, mean, var)


if __name__ == "__main__":
    # Small shapes consistent with the module: batch=2, in_channel1=4,
    # in_channel2=8, out_channel=32, spatial=16x16.
    N, C1, C2, Cout, H, W = 2, 4, 8, 32, 16, 16

    key = jax.random.PRNGKey(0)
    kf, kb, kw1, kw2, kw3 = jax.random.split(key, 5)

    foreg = jax.random.normal(kf, (N, C1, H, W), jnp.float32)
    backg = jax.random.normal(kb, (N, C2, H, W), jnp.float32)

    weights = (
        make_weights(kw1, C1, Cout),    # conv1 / bn1
        make_weights(kw2, C2, Cout),    # conv2 / bn2
        make_weights(kw3, Cout, Cout),  # conv3 / bn3
    )

    ref = jax.block_until_ready(outedge_reference(foreg, backg, weights))

    # f32 compute path (tight tolerance).
    out = jax.block_until_ready(outedge_forward(foreg, backg, weights, tm=1024))
    assert out.shape == (N, Cout, H, W)
    assert jnp.allclose(out, ref, atol=2e-4, rtol=2e-4), "f32 mismatch vs reference"

    # bf16 compute path (halves HBM traffic; f32 accumulation) -- looser tolerance.
    out_bf16 = jax.block_until_ready(
        outedge_forward(foreg, backg, weights, tm=1024, compute_dtype=jnp.bfloat16)
    )
    assert out_bf16.shape == (N, Cout, H, W)
    assert jnp.allclose(out_bf16, ref, atol=5e-2, rtol=5e-2), "bf16 mismatch vs reference"

    print("KERNEL_OK")
</pallas_src>

<mosaic_0001>
module attributes {stable_mosaic.version = 11 : i64} {
  func.func @_outedge_kernel(%arg0: i32, %arg1: i32, %arg2: memref<1x4x256xf32, #tpu.memory_space<vmem>>, %arg3: memref<1x8x256xf32, #tpu.memory_space<vmem>>, %arg4: memref<32x4xf32, #tpu.memory_space<vmem>>, %arg5: memref<32x8xf32, #tpu.memory_space<vmem>>, %arg6: memref<32x32xf32, #tpu.memory_space<vmem>>, %arg7: memref<32x3xf32, #tpu.memory_space<vmem>>, %arg8: memref<1x32x256xf32, #tpu.memory_space<vmem>>) attributes {dimension_semantics = [#tpu.dimension_semantics<parallel>, #tpu.dimension_semantics<parallel>], iteration_bounds = array<i64: 2, 1>, scalar_prefetch = 0 : i64, scratch_operands = 0 : i64, tpu.core_type = #tpu.core_type<tc>, window_params = [{transform_indices = @transform_0, window_bounds = array<i64: 1, 4, 256>}, {transform_indices = @transform_1, window_bounds = array<i64: 1, 8, 256>}, {pipeline_mode = #tpu.pipeline_mode<synchronous>, transform_indices = @transform_2, window_bounds = array<i64: 32, 4>}, {pipeline_mode = #tpu.pipeline_mode<synchronous>, transform_indices = @transform_3, window_bounds = array<i64: 32, 8>}, {pipeline_mode = #tpu.pipeline_mode<synchronous>, transform_indices = @transform_4, window_bounds = array<i64: 32, 32>}, {pipeline_mode = #tpu.pipeline_mode<synchronous>, transform_indices = @transform_5, window_bounds = array<i64: 32, 3>}, {transform_indices = @transform_6, window_bounds = array<i64: 1, 32, 256>}]} {
    %c0 = arith.constant 0 : index
    %c0_0 = arith.constant 0 : index
    %0 = vector.load %arg7[%c0, %c0_0] : memref<32x3xf32, #tpu.memory_space<vmem>>, vector<32x1xf32>
    %c0_1 = arith.constant 0 : index
    %c1 = arith.constant 1 : index
    %1 = vector.load %arg7[%c0_1, %c1] : memref<32x3xf32, #tpu.memory_space<vmem>>, vector<32x1xf32>
    %c0_2 = arith.constant 0 : index
    %c2 = arith.constant 2 : index
    %2 = vector.load %arg7[%c0_2, %c2] : memref<32x3xf32, #tpu.memory_space<vmem>>, vector<32x1xf32>
    %c0_3 = arith.constant 0 : index
    %c0_4 = arith.constant 0 : index
    %3 = vector.load %arg4[%c0_3, %c0_4] : memref<32x4xf32, #tpu.memory_space<vmem>>, vector<32x4xf32>
    %c0_5 = arith.constant 0 : index
    %c0_6 = arith.constant 0 : index
    %c0_7 = arith.constant 0 : index
    %4 = vector.load %arg2[%c0_5, %c0_6, %c0_7] : memref<1x4x256xf32, #tpu.memory_space<vmem>>, vector<1x4x256xf32>
    %5 = vector.shape_cast %4 : vector<1x4x256xf32> to vector<4x256xf32>
    %cst = arith.constant dense<0.000000e+00> : vector<32x256xf32>
    %6 = tpu.matmul %3, %5, %cst {dimension_numbers = #tpu.dot_dimension_numbers<[1], [0], [0], [1], [0, 0, 1, 1], [], []>} : vector<32x4xf32>, vector<4x256xf32>, vector<32x256xf32> -> vector<32x256xf32>
    %7 = vector.broadcast %0 : vector<32x1xf32> to vector<32x256xf32>
    %8 = arith.addf %6, %7 : vector<32x256xf32>
    %cst_8 = arith.constant 0.000000e+00 : f32
    %9 = vector.broadcast %cst_8 : f32 to vector<32x256xf32>
    %10 = arith.maximumf %8, %9 : vector<32x256xf32>
    %c0_9 = arith.constant 0 : index
    %c0_10 = arith.constant 0 : index
    %11 = vector.load %arg5[%c0_9, %c0_10] : memref<32x8xf32, #tpu.memory_space<vmem>>, vector<32x8xf32>
    %c0_11 = arith.constant 0 : index
    %c0_12 = arith.constant 0 : index
    %c0_13 = arith.constant 0 : index
    %12 = vector.load %arg3[%c0_11, %c0_12, %c0_13] : memref<1x8x256xf32, #tpu.memory_space<vmem>>, vector<1x8x256xf32>
    %13 = vector.shape_cast %12 : vector<1x8x256xf32> to vector<8x256xf32>
    %cst_14 = arith.constant dense<0.000000e+00> : vector<32x256xf32>
    %14 = tpu.matmul %11, %13, %cst_14 {dimension_numbers = #tpu.dot_dimension_numbers<[1], [0], [0], [1], [0, 0, 1, 1], [], []>} : vector<32x8xf32>, vector<8x256xf32>, vector<32x256xf32> -> vector<32x256xf32>
    %15 = vector.broadcast %1 : vector<32x1xf32> to vector<32x256xf32>
    %16 = arith.addf %14, %15 : vector<32x256xf32>
    %cst_15 = arith.constant 0.000000e+00 : f32
    %17 = vector.broadcast %cst_15 : f32 to vector<32x256xf32>
    %18 = arith.maximumf %16, %17 : vector<32x256xf32>
    %19 = arith.subf %10, %18 : vector<32x256xf32>
    %c0_16 = arith.constant 0 : index
    %c0_17 = arith.constant 0 : index
    %20 = vector.load %arg6[%c0_16, %c0_17] : memref<32x32xf32, #tpu.memory_space<vmem>>, vector<32x32xf32>
    %cst_18 = arith.constant dense<0.000000e+00> : vector<32x256xf32>
    %21 = tpu.matmul %20, %19, %cst_18 {dimension_numbers = #tpu.dot_dimension_numbers<[1], [0], [0], [1], [0, 0, 1, 1], [], []>} : vector<32x32xf32>, vector<32x256xf32>, vector<32x256xf32> -> vector<32x256xf32>
    %22 = vector.broadcast %2 : vector<32x1xf32> to vector<32x256xf32>
    %23 = arith.addf %21, %22 : vector<32x256xf32>
    %cst_19 = arith.constant 0.000000e+00 : f32
    %24 = vector.broadcast %cst_19 : f32 to vector<32x256xf32>
    %25 = arith.maximumf %23, %24 : vector<32x256xf32>
    %c0_20 = arith.constant 0 : index
    %c0_21 = arith.constant 0 : index
    %c0_22 = arith.constant 0 : index
    %26 = vector.load %arg8[%c0_20, %c0_21, %c0_22] : memref<1x32x256xf32, #tpu.memory_space<vmem>>, vector<1x32x256xf32>
    %27 = vector.shape_cast %26 : vector<1x32x256xf32> to vector<32x256xf32>
    %28 = vector.shape_cast %25 : vector<32x256xf32> to vector<1x32x256xf32>
    tpu.vector_store %arg8[%c0_20, %c0_21, %c0_22], %28 {strides = array<i32>} : memref<1x32x256xf32, #tpu.memory_space<vmem>>, vector<1x32x256xf32>,
    return
  }
  func.func @transform_0(%arg0: i32, %arg1: i32) -> (i32, i32, i32) {
    %c0_i32 = arith.constant 0 : i32
    %c0_i32_0 = arith.constant 0 : i32
    return %arg0, %c0_i32, %arg1 : i32, i32, i32
  }
  func.func @transform_1(%arg0: i32, %arg1: i32) -> (i32, i32, i32) {
    %c0_i32 = arith.constant 0 : i32
    %c0_i32_0 = arith.constant 0 : i32
    return %arg0, %c0_i32, %arg1 : i32, i32, i32
  }
  func.func @transform_2(%arg0: i32, %arg1: i32) -> (i32, i32) {
    %c0_i32 = arith.constant 0 : i32
    %c0_i32_0 = arith.constant 0 : i32
    %c0_i32_1 = arith.constant 0 : i32
    return %c0_i32, %c0_i32_0 : i32, i32
  }
  func.func @transform_3(%arg0: i32, %arg1: i32) -> (i32, i32) {
    %c0_i32 = arith.constant 0 : i32
    %c0_i32_0 = arith.constant 0 : i32
    %c0_i32_1 = arith.constant 0 : i32
    return %c0_i32, %c0_i32_0 : i32, i32
  }
  func.func @transform_4(%arg0: i32, %arg1: i32) -> (i32, i32) {
    %c0_i32 = arith.constant 0 : i32
    %c0_i32_0 = arith.constant 0 : i32
    %c0_i32_1 = arith.constant 0 : i32
    return %c0_i32, %c0_i32_0 : i32, i32
  }
  func.func @transform_5(%arg0: i32, %arg1: i32) -> (i32, i32) {
    %c0_i32 = arith.constant 0 : i32
    %c0_i32_0 = arith.constant 0 : i32
    %c0_i32_1 = arith.constant 0 : i32
    return %c0_i32, %c0_i32_0 : i32, i32
  }
  func.func @transform_6(%arg0: i32, %arg1: i32) -> (i32, i32, i32) {
    %c0_i32 = arith.constant 0 : i32
    %c0_i32_0 = arith.constant 0 : i32
    return %arg0, %c0_i32, %arg1 : i32, i32, i32
  }
}

</mosaic_0001>

<bundles_post_ra>
// kernel: tpu_custom_call.1
= control target key start
LH: loop header
LB: loop body
LE: loop exit
PB: predicated region body
PF: predicated region fallthrough
CT: control target
= control target key end

     0   :  { %11 = vsyncpa [#allocation3], 0  ;;  %s1284_s0 = inlined_call_operand.vmem [shape: f32[2,4,256], index: 0, kind: input, shape index: {}]   ;;  %s1285_s1 = inlined_call_operand.vmem [shape: f32[2,8,256], index: 1, kind: input, shape index: {}]   ;;  %s1286_s2 = inlined_call_operand.vmem [shape: f32[32,4], index: 2, kind: input, shape index: {}]   ;;  %s1287_s3 = inlined_call_operand.vmem [shape: f32[32,8], index: 3, kind: input, shape index: {}]   ;;  %s1288_s4 = inlined_call_operand.vmem [shape: f32[32,32], index: 4, kind: input, shape index: {}]   ;;  %s1289_s5 = inlined_call_operand.vmem [shape: f32[32,3], index: 5, kind: input, shape index: {}]   ;;  %s1290_s6 = inlined_call_operand.hbm [shape: f32[2,32,256], index: 6, kind: output, shape index: {}]  }
   0x1   :  { %13 = vsyncpa [#allocation3 + $0x1], 0  ;;  %s1087_s21 = smov 0   ;;  %s1089_s22 = smov 0  }
   0x2   :  { %s1091_s23 = smov 0   ;;  %s1093_s24 = smov 0  }
   0x3   :  { %s1095_s25 = smov 0   ;;  %s1097_s26 = smov 0  }
   0x4 LB: > { %s854_s27 = sadd.s32 4294967295, %s1043_s26   ;;  %s855_s28 = sadd.s32 4294967294, %s1043_s26   ;;  %s1043_s26 = sphi %s1097_s26, %s19_s26   ;;  %s1039_s25 = sphi %s1095_s25, %s1297_s25   ;;  %s1035_s24 = sphi %s1093_s24, %s1296_s24   ;;  %s1031_s23 = sphi %s1091_s23, %s1295_s23   ;;  %s1027_s22 = sphi %s1089_s22, %s1294_s22   ;;  %s1023_s21 = sphi %s1087_s21, %s1293_s21  }
   0x5   : > { %s31_s29 = sadd.s32 1, %s1039_s25  ;;  %s180_s30 = sadd.s32 1, %s1031_s23 }
   0x6   : > { %p33_p0 = scmp.ge.s32.totalorder %s31_s29, 2  ;;  %p190_p1 = scmp.ne.s32.totalorder %s1031_s23, %s1027_s22 }
   0x7   : > { %p191_p2 = scmp.eq.s32.totalorder %s854_s27, 1  ;;  %p196_p3 = scmp.ne.s32.totalorder %s1027_s22, %s1023_s21 }
   0x8   : > { %s1299_s29 = smov (%p33_p0, %s31_s29), 0  ;;  %p197_p5 = scmp.eq.s32.totalorder %s855_s28, 1 }
   0x9   : > { %p1127_p4 = por %p191_p2, %p190_p1  ;;  %s175_s8 = ssub.s32 %s1039_s25, %s1299_s29 }
   0xa   : > { %p858_p6 = scmp.ge.s32.totalorder %s1043_s26, 1  ;;  %p178_p7 = scmp.eq.s32.totalorder %s175_s8, 0 }
   0xb   : > { %p1134_p8 = por %p197_p5, %p196_p3  ;;  %p253_p9 = scmp.lt.s32.totalorder %s1043_s26, 3 }
   0xc   : > { %s1140_s10 = scalar_select %p178_p7, %s1031_s23, %s180_s30  }
   0xd   : > { %p254_p10 = pnand %p858_p6, %p253_p9 }
   0xe   : > { %p297_p11 = scmp.lt.s32.totalorder (!%p254_p10), %s1035_s24, 1  ;;  %v1045_v0 = vmov (!%p254_p10), 0.0   ;;  %v1046_v1 = vmov (!%p254_p10), 0   ;;  %v1047_v2 = vmov (!%p254_p10), 1   ;;  %v317_v3 = vld [vmem:[%s1289_s5] sm:$0xff] (!%p254_p10)  ;;  %v318_v4 = vld [vmem:[%s1289_s5 + $0x8] sm:$0xff] (!%p254_p10) }
   0xf   : > { %257 = sbr.rel (%p254_p10) target bundleno = 520 (0x208), region = 44  ;;  %442 = vmatprep.mubr.f32.mxu1 (!%p254_p10), %v1045_v0  ;;  %430 = vmatprep.mubr.f32.mxu0 (!%p254_p10), %v1045_v0  ;;  %vm361_vm0 = vcmask (!%p254_p10), 1043456   ;;  %v323_v7 = vld [vmem:[%s1286_s2 + $0x10] sm:$0xff] (!%p254_p10)  ;;  %vm348_vm1 = vcmask (!%p254_p10), 31744   ;;  %v321_v10 = vld [vmem:[%s1286_s2] sm:$0xff] (!%p254_p10)  ;;  %v324_v12 = vld [vmem:[%s1286_s2 + $0x18] sm:$0xff] (!%p254_p10) }
  0x10   : > { %957 = vset.pattern.permute.xlu0 (!%p254_p10), %v1046_v1  ;;  %958 = vset.pattern.permute.xlu1 (!%p254_p10), %v1047_v2  ;;  %v319_v11 = vld [vmem:[%s1289_s5 + $0x10] sm:$0xff] (!%p254_p10)  ;;  %v320_v13 = vld [vmem:[%s1289_s5 + $0x18] sm:$0xff] (!%p254_p10)  ;;  %v322_v14 = vld [vmem:[%s1286_s2 + $0x8] sm:$0xff] (!%p254_p10)  ;;  %vm485_vm2 = vcmask (!%p254_p10), 64512   ;;  %v1048_v19 = vmov (!%p254_p10), 2   ;;  %vm623_vm3 = vcmask (!%p254_p10), 261120  }
  0x11   : > { %328 = vperm.xlu0 (!%p254_p10), %957, %v317_v3   ;;  %470 = vperm.xlu1 (!%p254_p10), %958, %v317_v3   ;;  %v463_v15 = vld [vmem:[%s1287_s3] sm:$0xff] (!%p254_p10)  ;;  %v464_v16 = vld [vmem:[%s1287_s3 + $0x8] sm:$0xff] (!%p254_p10)  ;;  %v465_v17 = vld [vmem:[%s1287_s3 + $0x10] sm:$0xff] (!%p254_p10)  ;;  %s293_s8 = sand.u32 (!%p254_p10), 1, %s1027_s22   ;;  %s885_s13 = sshll.u32 (!%p254_p10), %s1035_s24, 10 }
  0x12   : > { %v466_v18 = vld [vmem:[%s1287_s3 + $0x18] sm:$0xff] (!%p254_p10)  ;;  %s859_s12 = sshll.u32 (!%p254_p10), %s293_s8, 6  ;;  %s1230_s17 = scalar_lea.hbm (!%p254_p10), %s1290_s6, %s885_s13 }
  0x13   : > { %s1049_s19 = smov (!%p254_p10), [#allocation2]  }
  0x14   : > { %s969_s20 = sshll.u32 (!%p254_p10), %s1049_s19, 4  ;;  %s970_s20 = int_to_ptr.vmem [resolvable:$false] %s969_s20 }
  0x15   : > { %333 = vperm.xlu0 (!%p254_p10), %957, %v318_v4   ;;  %474 = vperm.xlu1 (!%p254_p10), %958, %v318_v4  }
  0x16   : > { %s298_s11 = scalar_select %p297_p11, %s1035_s24, 1 }
  0x17   : > { %s1238_s24 = scalar_lea.sflag [#allocation3], %s293_s8 }
  0x18   : > { %s883_s14 = sshll.u32 %s298_s11, 3  ;;  %s884_s15 = sshll.u32 %s298_s11, 4 }
  0x19   : > { %s304_s18 = scalar_lea.vmem %s1284_s0, %s883_s14  ;;  %s314_s27 = scalar_lea.vmem %s1285_s1, %s884_s15  ;;  %338 = vperm.xlu0 %957, %v319_v11   ;;  %959 = vset.pattern.permute.xlu1 %v1046_v1 }
  0x1a   : > { %v325_v5 = vld [vmem:[%s304_s18] sm:$0xff]  ;;  %v468_v8 = vld [vmem:[%s314_s27 + $0x8] sm:$0xff]  ;;  %343 = vperm.xlu1 %959, %v320_v13   ;;  %s1217_s11 = scalar_lea.vmem [#allocation2], %s859_s12 }
  0x1b   : > { %v347_v6 = vcombine.high %v325_v5, %v325_v5  ;;  %v467_v9 = vld [vmem:[%s314_s27] sm:$0xff]  ;;  %s757_s14 = sshll.u32 %s1217_s11, 4  ;;  %s971_s27 = scalar_lea.vmem %s970_s20, 2048  ;;  %s1232_s14 = int_to_ptr.vmem [resolvable:$true] %s757_s14 }
  0x1c   : > { %s965_s18 = scalar_lea.vmem %s1232_s14, 1024  ;;  %p972_p1 = scmp.lt.s32.totalorder %s1232_s14, %s970_s20 }
  0x1d   : > { %894 = vmatprep.subr.msk.mxu1 %vm361_vm0, %v347_v6  ;;  %864 = vmatprep.subr.msk.mxu0 %vm361_vm0, %v347_v6  ;;  %p966_p12 = scmp.ne.s32.totalorder %s1232_s14, %s965_s18  ;;  %p973_p2 = scmp.lt.s32.totalorder %s971_s27, %s965_s18 }
  0x1e   : > { %895 = vmatpush1.msk.msra.mxu1 %vm361_vm0, %v325_v5  ;;  %865 = vmatpush1.msk.msra.mxu0 %vm361_vm0, %v325_v5 }
  0x1f   : > { %868 = vmatmul.mubr.msk.f32.vlgmr.msra.gmra.mrb[0].mxu1 %vm348_vm1, %v323_v7  ;;  %498 = vmatprep.subr.mxu1 %v468_v8  ;;  %p967_p13 = pnand %p966_p12, %p1127_p4  ;;  %p974_p3 = por %p973_p2, %p972_p1 }
  0x20   : > { %499 = vmatpush1.msra.mxu1 %v467_v9  ;;  %866 = vmatmul.mubr.msk.f32.vlgmr.msra.gmra.mrb[0].mxu0 %vm348_vm1, %v321_v10 }
  0x21   : > { %448 = vmatprep.mubr.f32.mxu1 %v1045_v0  ;;  %436 = vmatprep.mubr.f32.mxu0 %v1045_v0  ;;  %p968_p0 = pneg %p967_p13 }
  0x22   : > { %960 = vset.pattern.permute.xlu0 %v1047_v2  ;;  %961 = vset.pattern.permute.xlu1 %v1047_v2 }
  0x23   : > { %869 = vmatmul.mubr.msk.f32.gmra.mrb[2].mxu1 %vm348_vm1, %v324_v12  ;;  %478 = vperm.xlu0 %960, %v319_v11   ;;  %p975_p5 = pnand %p974_p3, %p968_p0 }
  0x24   : > { %867 = vmatmul.mubr.msk.f32.gmra.mrb[2].mxu0 %vm348_vm1, %v322_v14  ;;  %562 = vmatprep.mubr.f32.mxu1 %v1045_v0 }
  0x25   : > { %700 = vmatprep.mubr.f32.mxu0 %v1045_v0  ;;  %482 = vperm.xlu1 %961, %v320_v13  }
  0x27   : > { %870 = vmatmul.mubr.msk.f32.vlgmr.msra.gmra.mrb[4].mxu1 %vm485_vm2, %v463_v15  ;;  %963 = vset.pattern.permute.xlu0 %v1048_v19 }
  0x28   : > { %568 = vmatprep.mubr.f32.mxu1 %v1045_v0  ;;  %612 = vperm.xlu0 %963, %v318_v4  }
  0x29   : > { %962 = vset.pattern.permute.xlu1 %v1048_v19 }
  0x2a   : > { %608 = vperm.xlu1 %962, %v317_v3  }
  0x2b   : > { %871 = vmatmul.mubr.msk.f32.gmra.mrb[6].mxu1 %vm485_vm2, %v464_v16 }
  0x2c   : > { %574 = vmatprep.mubr.f32.mxu1 %v1045_v0 }
  0x2e   : > { %616 = vperm.xlu1 %962, %v319_v11  }
  0x2f   : > { %872 = vmatmul.mubr.msk.f32.gmra.mrb[8].mxu1 %vm485_vm2, %v465_v17 }
  0x30   : > { %580 = vmatprep.mubr.f32.mxu1 %v1045_v0 }
  0x32   : > { %620 = vperm.xlu1 %962, %v320_v13  }
  0x33   : > { %873 = vmatmul.mubr.msk.f32.gmra.mrb[10].mxu1 %vm485_vm2, %v466_v18 }
  0x90   : > { %v329_v20 = vpop.permute.xlu0 %328  ;;  %v471_v24 = vpop.permute.xlu1 %470 }
  0x94   : > { %v334_v26 = vpop.permute.xlu0 %333  ;;  %v475_v33 = vpop.permute.xlu1 %474 }
  0x98   : > { %v339_v38 = vpop.permute.xlu0 %338 }
  0x99   : > { %v344_v49 = vpop.permute.xlu1 %343 }
  0xa2   : > { %v479_v52 = vpop.permute.xlu0 %478 }
  0xa4   : > { %v483_v2 = vpop.permute.xlu1 %482 }
  0xf2   : > { %v444_v21 = vpop.f32.mrb[0].mxu1 }
  0xf3   : > { %v446_v22 = vpop.f32.mrb[1].mxu1  ;;  %v432_v23 = vpop.f32.mrb[0].mxu0  ;;  %v445_v53 = vadd.f32 %v444_v21, %v339_v38 }
  0xf4   : > { %v434_v25 = vpop.f32.mrb[1].mxu0  ;;  %v433_v28 = vadd.f32 %v432_v23, %v329_v20  ;;  %v447_v56 = vadd.f32 %v446_v22, %v339_v38 }
  0xf5   : > { %v435_v31 = vadd.f32 %v434_v25, %v329_v20  ;;  %v459_v3 = vmax.f32 %v445_v53, 0.0  ;;  %v603_v25 = vld [vmem:[%s1288_s4] sm:$0xff] }
  0xf6   : > { %v450_v27 = vpop.f32.mrb[2].mxu1  ;;  %v455_v35 = vmax.f32 %v433_v28, 0.0  ;;  %v460_v7 = vmax.f32 %v447_v56, 0.0  ;;  %v606_v28 = vld [vmem:[%s1288_s4 + $0x18] sm:$0xff] }
  0xf7   : > { %v452_v29 = vpop.f32.mrb[3].mxu1  ;;  %v438_v30 = vpop.f32.mrb[2].mxu0  ;;  %v456_v39 = vmax.f32 %v435_v31, 0.0  ;;  %v451_v4 = vadd.f32 %v450_v27, %v344_v49  ;;  %v605_v27 = vld [vmem:[%s1288_s4 + $0x10] sm:$0xff] }
  0xf8   : > { %v440_v32 = vpop.f32.mrb[3].mxu0  ;;  %v439_v41 = vadd.f32 %v438_v30, %v334_v26  ;;  %v453_v8 = vadd.f32 %v452_v29, %v344_v49  ;;  %v609_v29 = vpop.permute.xlu1 %608 }
  0xf9   : > { %v441_v43 = vadd.f32 %v440_v32, %v334_v26  ;;  %v461_v17 = vmax.f32 %v451_v4, 0.0  ;;  %v604_v26 = vld [vmem:[%s1288_s4 + $0x8] sm:$0xff] }
  0xfa   : > { %v564_v34 = vpop.f32.mrb[4].mxu1  ;;  %v457_v54 = vmax.f32 %v439_v41, 0.0  ;;  %v462_v19 = vmax.f32 %v453_v8, 0.0 }
  0xfb   : > { %v565_v36 = vadd.f32 %v564_v34, %v471_v24  ;;  %v566_v37 = vpop.f32.mrb[5].mxu1  ;;  %v458_v57 = vmax.f32 %v441_v43, 0.0  ;;  %v613_v34 = vpop.permute.xlu0 %612 }
  0xfc   : > { %v567_v40 = vadd.f32 %v566_v37, %v471_v24 }
  0xfd   : > { %v587_v42 = vmax.f32 %v565_v36, 0.0 }
  0xfe   : > { %v588_v44 = vmax.f32 %v567_v40, 0.0  ;;  %v570_v45 = vpop.f32.mrb[6].mxu1 }
  0xff   : > { %v595_v46 = vsub.f32 %v455_v35, %v587_v42  ;;  %v571_v47 = vadd.f32 %v570_v45, %v475_v33  ;;  %v572_v48 = vpop.f32.mrb[7].mxu1 }
 0x100   : > { %v596_v50 = vsub.f32 %v456_v39, %v588_v44  ;;  %v573_v51 = vadd.f32 %v572_v48, %v475_v33  ;;  %v617_v39 = vpop.permute.xlu1 %616 }
 0x101   : > { %v589_v55 = vmax.f32 %v571_v47, 0.0 }
 0x102   : > { %v590_v58 = vmax.f32 %v573_v51, 0.0  ;;  %v576_v59 = vpop.f32.mrb[8].mxu1 }
 0x103   : > { %v597_v60 = vsub.f32 %v457_v54, %v589_v55  ;;  %v577_v61 = vadd.f32 %v576_v59, %v479_v52  ;;  %v578_v62 = vpop.f32.mrb[9].mxu1 }
 0x104   : > { %v598_v63 = vsub.f32 %v458_v57, %v590_v58  ;;  %v579_v1 = vadd.f32 %v578_v62, %v479_v52  ;;  %v621_v48 = vpop.permute.xlu1 %620 }
 0x105   : > { %v888_v5 = vpack.c.bf16 %v597_v60, %v595_v46  ;;  %v591_v6 = vmax.f32 %v577_v61, 0.0 }
 0x106   : > { %v592_v9 = vmax.f32 %v579_v1, 0.0  ;;  %v582_v10 = vpop.f32.mrb[10].mxu1  ;;  %v886_v11 = vpack.c.bf16 %v598_v63, %v596_v50 }
 0x107   : > { %v599_v12 = vsub.f32 %v459_v3, %v591_v6  ;;  %v583_v13 = vadd.f32 %v582_v10, %v483_v2  ;;  %v584_v14 = vpop.f32.mrb[11].mxu1 }
 0x108   : > { %v600_v15 = vsub.f32 %v460_v7, %v592_v9  ;;  %v585_v16 = vadd.f32 %v584_v14, %v483_v2  ;;  %887 = vmatprep.subr.bf16.mxu0 %v886_v11 }
 0x109   : > { %v593_v18 = vmax.f32 %v583_v13, 0.0  ;;  %889 = vmatpush1.bf16.msra.mxu0 %v888_v5 }
 0x10a   : > { %v594_v20 = vmax.f32 %v585_v16, 0.0 }
 0x10b   : > { %v601_v21 = vsub.f32 %v461_v17, %v593_v18 }
 0x10c   : > { %v602_v22 = vsub.f32 %v462_v19, %v594_v20 }
 0x10d   : > { %v892_v23 = vpack.c.bf16 %v601_v21, %v599_v12 }
 0x10e   : > { %v890_v24 = vpack.c.bf16 %v602_v22, %v600_v15 }
 0x110   : > { %891 = vmatprep.subr.bf16.mxu0 %v890_v24 }
 0x111   : > { %893 = vmatpush1.bf16.msra.mxu0 %v892_v23 }
 0x114   : > { %874 = vmatmul.mubr.msk.f32.vlgmr.msra.gmra.mrb[4].mxu0 %vm623_vm3, %v603_v25 }
 0x115   : > { %706 = vmatprep.mubr.f32.mxu0 %v1045_v0 }
 0x118   : > { %875 = vmatmul.mubr.msk.f32.gmra.mrb[6].mxu0 %vm623_vm3, %v604_v26 }
 0x119   : > { %712 = vmatprep.mubr.f32.mxu0 %v1045_v0 }
 0x11c   : > { %876 = vmatmul.mubr.msk.f32.gmra.mrb[8].mxu0 %vm623_vm3, %v605_v27 }
 0x11d   : > { %718 = vmatprep.mubr.f32.mxu0 %v1045_v0 }
 0x120   : > { %877 = vmatmul.mubr.msk.f32.gmra.mrb[10].mxu0 %vm623_vm3, %v606_v28 }
 0x1e7   : > { %v702_v30 = vpop.f32.mrb[4].mxu0 }
 0x1e8   : > { %v703_v31 = vadd.f32 %v702_v30, %v609_v29  ;;  %v704_v32 = vpop.f32.mrb[5].mxu0 }
 0x1e9   : > { %v705_v33 = vadd.f32 %v704_v32, %v609_v29 }
 0x1ea   : > { %v725_v35 = vmax.f32 %v703_v31, 0.0 }
 0x1eb   : > { %v726_v36 = vmax.f32 %v705_v33, 0.0  ;;  %v708_v37 = vpop.f32.mrb[6].mxu0 }
 0x1ec   : > { %733 = vst [vmem:[%s1217_s11] sm:$0xff] %v725_v35  ;;  %v709_v0 = vadd.f32 %v708_v37, %v613_v34  ;;  %v710_v38 = vpop.f32.mrb[7].mxu0 }
 0x1ed   : > { %734 = vst [vmem:[%s1217_s11 + $0x8] sm:$0xff] %v726_v36  ;;  %v711_v40 = vadd.f32 %v710_v38, %v613_v34 }
 0x1ee   : > { %v727_v41 = vmax.f32 %v709_v0, 0.0 }
 0x1ef   : > { %v728_v42 = vmax.f32 %v711_v40, 0.0  ;;  %v714_v43 = vpop.f32.mrb[8].mxu0 }
 0x1f0   : > { %735 = vst [vmem:[%s1217_s11 + $0x10] sm:$0xff] %v727_v41  ;;  %v715_v44 = vadd.f32 %v714_v43, %v617_v39  ;;  %v716_v45 = vpop.f32.mrb[9].mxu0 }
 0x1f1   : > { %736 = vst [vmem:[%s1217_s11 + $0x18] sm:$0xff] %v728_v42  ;;  %v717_v46 = vadd.f32 %v716_v45, %v617_v39 }
 0x1f2   : > { %v729_v47 = vmax.f32 %v715_v44, 0.0 }
 0x1f3   : > { %v730_v49 = vmax.f32 %v717_v46, 0.0  ;;  %v720_v50 = vpop.f32.mrb[10].mxu0 }
 0x1f4   : > { %737 = vst [vmem:[%s1217_s11 + $0x20] sm:$0xff] %v729_v47  ;;  %v721_v51 = vadd.f32 %v720_v50, %v621_v48  ;;  %v722_v52 = vpop.f32.mrb[11].mxu0 }
 0x1f5   : > { %738 = vst [vmem:[%s1217_s11 + $0x28] sm:$0xff] %v730_v49  ;;  %v723_v53 = vadd.f32 %v722_v52, %v621_v48 }
 0x1f6   : > { %v731_v54 = vmax.f32 %v721_v51, 0.0 }
 0x1f7   : > { %v732_v55 = vmax.f32 %v723_v53, 0.0 }
 0x1f8   : > { %739 = vst [vmem:[%s1217_s11 + $0x30] sm:$0xff] %v731_v54 }
 0x1f9   : > { %740 = vst [vmem:[%s1217_s11 + $0x38] sm:$0xff] %v732_v55 }
 0x1fa   : > { %978 = shalt.err (!%p975_p5)
}
 0x1fb   : > { %s979_s28 = scalar_lea.hbm %s1230_s17, 1024  ;;  %s983_s12 = scalar_lea.hbm %s1290_s6, 2048 }
 0x1fc   : > { %p980_p6 = scmp.ne.s32.totalorder %s1230_s17, %s979_s28  ;;  %p984_p10 = scmp.lt.u32.totalorder %s1230_s17, %s1290_s6 }
 0x1fd   : > { %p985_p11 = scmp.lt.u32.totalorder %s983_s12, %s979_s28  ;;  %p987_p13 = scmp.lt.u32.totalorder %s979_s28, %s1230_s17 }
 0x1fe   : > { %p981_p7 = pnand %p980_p6, %p1127_p4 }
 0x1ff   : > { %p986_p12 = por %p985_p11, %p984_p10 }
 0x200   : > { %p982_p9 = pneg %p981_p7 }
 0x201   : > { %p988_p0 = por %p987_p13, %p986_p12 }
 0x203   : > { %p989_p1 = pnand %p988_p0, %p982_p9 }
 0x205   : > { %992 = shalt.err (!%p989_p1)
}
 0x206   : > { %s1050_s15 = smov 256   ;;  %s1051_s16 = smov 16  }
 0x207   : > { %896 = dma.vmem_to_hbm [thread:$0]  (%p1127_p4), %s1232_s14, 1024, %s1230_s17, %s1238_s24, %s1050_s15, %s1050_s15, %s1051_s16  }
 0x208 PF: > { %p902_p2 = scmp.ge.s32.totalorder %s1043_s26, 2  ;;  %s772_s18 = sand.u32 1, %s1023_s21  }
 0x209   : > { %s773_s19 = scalar_lea.sflag [#allocation3], %s772_s18 }
 0x20a   : > { %p899_p3 = pnand %p902_p2, %p1134_p8 }
 0x20c   : > { %1018 = dma.done.wait (!%p899_p3), %s773_s19, 1024  }
 0x20d   : > { %1020 = vsyncadd (!%p899_p3), %s773_s19, 4294966272  ;;  %s19_s26 = sadd.s32 1, %s1043_s26   ;;  %s1293_s21 = smov %s1027_s22 }
 0x20e   : > { %p16_p5 = scmp.ge.s32.totalorder %s19_s26, 4   ;;  %s1294_s22 = smov %s1031_s23 }
 0x20f   : > { %s1295_s23 = smov %s1140_s10  ;;  %s1296_s24 = smov %s1039_s25 }
 0x210   : > { %s1297_s25 = smov %s1299_s29  ;;  %18 = sbr.rel (!%p16_p5) target bundleno = 4 (0x4), region = 82 }
 0x217   :  { %778 = vsyncpa [#allocation3], 1 }
 0x218   :  { %780 = vsyncpa [#allocation3 + $0x1], 1 }

</bundles_post_ra>
